<compile_context>
chip_gen: v7x
topology: tpu7x:2x2x1
jax: 0.10.0
libtpu: 0.0.40
codegen_flags: <defaults>
</compile_context>

<pallas_src>
import functools

import jax
import jax.numpy as jnp
import numpy as np
from jax.experimental import pallas as pl
from jax.experimental.pallas import tpu as pltpu

LN_EPS = 1e-5  # PyTorch nn.LayerNorm default


def _round_up(n, m):
    return ((n + m - 1) // m) * m


# ------------------------------ fused kernel --------------------------------

def _fused_head_kernel(x_ref, w1_ref, b1_ref, avg1_ref,
                       w2_ref, b2_ref, avg2_ref,
                       w3_ref, b3_ref, o_ref):
    f32 = jnp.float32
    x = x_ref[...]

    # ---- proj1: Linear -> ReLU -> LN stats (affine folded into W2/b2) ----
    h = jnp.dot(x, w1_ref[...], preferred_element_type=f32) + b1_ref[...]
    h = jnp.maximum(h, 0.0)
    # mean broadcast to every lane via one MXU dot (avg1 = all-ones / d1)
    mu = jnp.dot(h, avg1_ref[...], preferred_element_type=f32)
    hc = h - mu
    var = jnp.dot(hc * hc, avg1_ref[...], preferred_element_type=f32)  # centered
    hn = hc * jax.lax.rsqrt(var + LN_EPS)

    # ---- all branch proj2's as one block-diagonal matmul (g1/be1 folded) ----
    g = jnp.dot(hn, w2_ref[...], preferred_element_type=f32) + b2_ref[...]
    g = jnp.maximum(g, 0.0)

    # ---- per-branch LN stats via the block averaging matrix (avg2) ----
    mu2 = jnp.dot(g, avg2_ref[...], preferred_element_type=f32)   # per-branch mean, lane-broadcast
    gc = g - mu2
    var2 = jnp.dot(gc * gc, avg2_ref[...], preferred_element_type=f32)
    gn = gc * jax.lax.rsqrt(var2 + LN_EPS)

    # ---- all branch proj3's (g2/be2 folded) into one lane-dense padded slab ----
    y = jnp.dot(gn, w3_ref[...], preferred_element_type=f32) + b3_ref[...]
    o_ref[...] = y.astype(o_ref.dtype)


# ------------------------------ pallas wrapper -------------------------------

_WEIGHTS = ("w1", "b1", "avg1", "w2", "b2", "avg2", "w3", "b3")


def _choose_tm(n_rows, tm):
    """Row tile: big by default; keep grid >= 2 and preferably even (v7x TCs)."""
    tm_eff = max(8, min(_round_up(tm, 8), _round_up(n_rows, 8)))
    n_tiles = pl.cdiv(n_rows, tm_eff)
    if n_tiles == 1 and n_rows > 8:
        tm_eff = max(8, _round_up(pl.cdiv(n_rows, 2), 8))        # split across 2 cores
    elif n_tiles > 1 and n_tiles % 2 == 1:
        tm_eff = max(8, _round_up(pl.cdiv(n_rows, n_tiles + 1), 8))  # even tile count
    return tm_eff


def _fused_head_call(x2d, fused, *, tm):
    N, d_model = x2d.shape
    P = fused["w3"].shape[1]
    tm_eff = _choose_tm(N, tm)
    grid = (pl.cdiv(N, tm_eff),)

    # VMEM budget from the actual footprint: double-buffered x/out row tiles
    # plus the (grid-invariant) packed weights; generous headroom, capped at
    # v7x's 64 MiB per-TC VMEM.
    elt = 4
    io_bytes = 2 * (tm_eff * d_model + tm_eff * P) * elt
    w_bytes = sum(int(np.prod(fused[k].shape)) for k in _WEIGHTS) * elt * 2
    vmem_limit = int(min(64 * 2 ** 20, max(16 * 2 ** 20, 2 * (io_bytes + w_bytes))))

    return pl.pallas_call(
        _fused_head_kernel,
        out_shape=jax.ShapeDtypeStruct((N, P), x2d.dtype),
        grid=grid,
        in_specs=[pl.BlockSpec((tm_eff, d_model), lambda i: (i, 0))]
                 + [pl.BlockSpec(fused[k].shape, lambda i: (0, 0)) for k in _WEIGHTS],
        out_specs=pl.BlockSpec((tm_eff, P), lambda i: (i, 0)),
        compiler_params=pltpu.CompilerParams(
            dimension_semantics=("parallel",),
            vmem_limit_bytes=vmem_limit,
        ),
    )(x2d, *[fused[k] for k in _WEIGHTS])


# --------------------- one-time host-side weight packing ---------------------

def pack_params(params, d_embed, embed_dims):
    """Pack per-branch weights into block-structured matrices (host-side, once).

    Folds both LayerNorm affines into the adjacent matmuls (exact algebra) and
    builds the averaging matrices used for the in-kernel LN statistics.
    """
    n_embed = len(embed_dims)
    two_d = 2 * d_embed
    d1 = n_embed * d_embed
    d2 = n_embed * two_d
    f32 = np.float32

    p1 = params["proj1"]
    w1 = np.asarray(p1["w"], f32)
    b1 = np.asarray(p1["b"], f32).reshape(1, d1)
    g1 = np.asarray(p1["gamma"], f32).reshape(d1)
    be1 = np.asarray(p1["beta"], f32).reshape(1, d1)

    total = int(np.sum(embed_dims))
    P = max(128, _round_up(total, 128))           # lane-dense, 128-padded output

    # Block-diagonal W2 (all branch proj2's as one matmul).
    w2 = np.zeros((d1, d2), f32)
    b2 = np.zeros((1, d2), f32)
    g2 = np.zeros((d2,), f32)
    be2 = np.zeros((1, d2), f32)
    for i in range(n_embed):
        r = slice(i * d_embed, (i + 1) * d_embed)
        c = slice(i * two_d, (i + 1) * two_d)
        w2[r, c] = np.asarray(params["proj2"][i]["w"], f32)
        b2[:, c] = np.asarray(params["proj2"][i]["b"], f32)
        g2[c] = np.asarray(params["proj2"][i]["gamma"], f32).reshape(two_d)
        be2[:, c] = np.asarray(params["proj2"][i]["beta"], f32)
    w2f = w2 * g1[:, None]            # diag(g1) @ W2
    b2f = be1 @ w2 + b2               # be1 folded into the bias

    # Block-row W3 into the padded concatenated output.
    offs = np.concatenate([[0], np.cumsum(embed_dims)]).astype(int)
    w3 = np.zeros((d2, P), f32)
    b3 = np.zeros((1, P), f32)
    for i in range(n_embed):
        c = slice(i * two_d, (i + 1) * two_d)
        o = slice(int(offs[i]), int(offs[i + 1]))
        w3[c, o] = np.asarray(params["proj3"][i]["w"], f32)
        b3[:, o] = np.asarray(params["proj3"][i]["b"], f32)
    w3f = w3 * g2[:, None]            # diag(g2) @ W3
    b3f = be2 @ w3 + b3

    # Averaging matrices: one MXU dot gives the (per-branch) mean broadcast
    # back to every lane.  avg1: all-ones / d1.  avg2: block-diagonal 1/two_d.
    avg1 = np.full((d1, d1), 1.0 / d1, f32)
    blk = np.arange(d2) // two_d
    avg2 = (blk[:, None] == blk[None, :]).astype(f32) / float(two_d)

    fused = dict(w1=w1, b1=b1, avg1=avg1, w2=w2f, b2=b2f, avg2=avg2,
                 w3=w3f, b3=b3f)
    return {k: jnp.asarray(v) for k, v in fused.items()}   # single device put each


# ------------------------------ forward pass ---------------------------------

def note_events_head_forward(x, fused, embed_dims, *, tm=1024):
    B, T, d_model = x.shape
    out = _fused_head_call(x.reshape(B * T, d_model), fused, tm=tm)
    offs = np.concatenate([[0], np.cumsum(embed_dims)]).astype(int)
    return [out[:, int(offs[i]):int(offs[i + 1])].reshape(B, T, int(n))
            for i, n in enumerate(embed_dims)]


# ------------------------- parameter construction ---------------------------

def init_params(key, d_model, d_embed, embed_dims, dtype=jnp.float32):
    n_embed = len(embed_dims)

    def lin_init(k, d_in, d_out):
        k1, k2 = jax.random.split(k)
        bound = 1.0 / np.sqrt(d_in)
        w = jax.random.uniform(k1, (d_in, d_out), dtype, -bound, bound)
        b = jax.random.uniform(k2, (1, d_out), dtype, -bound, bound)
        return w, b

    def ln_init(k, d):
        # Non-trivial affine params so the LN affine fold is actually tested
        # (PyTorch inits gamma=1, beta=0; semantics are the same).
        k1, k2 = jax.random.split(k)
        return (1.0 + 0.1 * jax.random.normal(k1, (1, d), dtype),
                0.1 * jax.random.normal(k2, (1, d), dtype))

    keys = jax.random.split(key, 2 + 3 * n_embed)
    d1 = d_embed * n_embed
    params = {}

    w1, b1 = lin_init(keys[0], d_model, d1)
    g1, be1 = ln_init(keys[1], d1)
    params["proj1"] = dict(w=w1, b=b1, gamma=g1, beta=be1)

    params["proj2"] = []
    params["proj3"] = []
    for i, n in enumerate(embed_dims):
        w2, b2 = lin_init(keys[2 + 3 * i], d_embed, 2 * d_embed)
        g2, be2 = ln_init(keys[3 + 3 * i], 2 * d_embed)
        params["proj2"].append(dict(w=w2, b=b2, gamma=g2, beta=be2))
        w3, b3 = lin_init(keys[4 + 3 * i], 2 * d_embed, n)
        params["proj3"].append(dict(w=w3, b=b3))
    return params


# --------------------------- pure-JAX reference ------------------------------

def note_events_head_reference(x, params, d_embed, embed_dims):
    def lin_relu_ln(z, p):
        h = jnp.maximum(z @ p["w"] + p["b"], 0.0)
        mu = jnp.mean(h, -1, keepdims=True)
        var = jnp.mean((h - mu) ** 2, -1, keepdims=True)
        return (h - mu) * jax.lax.rsqrt(var + LN_EPS) * p["gamma"] + p["beta"]

    B, T, d_model = x.shape
    xf = x.reshape(B * T, d_model)
    h = lin_relu_ln(xf, params["proj1"])
    outs = []
    for i, n in enumerate(embed_dims):
        hi = h[:, i * d_embed:(i + 1) * d_embed]
        gi = lin_relu_ln(hi, params["proj2"][i])
        yi = gi @ params["proj3"][i]["w"] + params["proj3"][i]["b"]
        outs.append(yi.reshape(B, T, n))
    return outs


# ----------------------------------- main ------------------------------------

if __name__ == "__main__":
    d_model = 32
    d_embed = 16
    embed_dims = (8, 12)          # -> n_embed = 2

    key = jax.random.PRNGKey(0)
    kp, kx1, kx2, kx3 = jax.random.split(key, 4)
    params = init_params(kp, d_model, d_embed, embed_dims)
    fused = pack_params(params, d_embed, embed_dims)   # packed once, host-side

    fwd = jax.jit(functools.partial(note_events_head_forward,
                                    embed_dims=embed_dims))

    # Case 1: tiny shape (2 small tiles).  Case 2: 2 full tiles, no tail.
    # Case 3: ragged row count -> exercises the masked tail block (no pad/slice).
    for (B, T), kx in (((2, 8), kx1), ((4, 160), kx2), ((3, 50), kx3)):
        x = jax.random.normal(kx, (B, T, d_model), jnp.float32)
        outs = jax.block_until_ready(fwd(x, fused))
        refs = note_events_head_reference(x, params, d_embed, embed_dims)
        for o, r in zip(outs, refs):
            np.testing.assert_allclose(np.asarray(o), np.asarray(r),
                                       rtol=2e-5, atol=2e-5)

    print("KERNEL_OK")
</pallas_src>

<mosaic_0001>
module attributes {stable_mosaic.version = 11 : i64} {
  func.func @_fused_head_kernel(%arg0: i32, %arg1: memref<8x32xf32, #tpu.memory_space<vmem>>, %arg2: memref<32x32xf32, #tpu.memory_space<vmem>>, %arg3: memref<1x32xf32, #tpu.memory_space<vmem>>, %arg4: memref<32x32xf32, #tpu.memory_space<vmem>>, %arg5: memref<32x64xf32, #tpu.memory_space<vmem>>, %arg6: memref<1x64xf32, #tpu.memory_space<vmem>>, %arg7: memref<64x64xf32, #tpu.memory_space<vmem>>, %arg8: memref<64x128xf32, #tpu.memory_space<vmem>>, %arg9: memref<1x128xf32, #tpu.memory_space<vmem>>, %arg10: memref<8x128xf32, #tpu.memory_space<vmem>>) attributes {dimension_semantics = [#tpu.dimension_semantics<parallel>], iteration_bounds = array<i64: 2>, scalar_prefetch = 0 : i64, scratch_operands = 0 : i64, tpu.core_type = #tpu.core_type<tc>, window_params = [{transform_indices = @transform_0, window_bounds = array<i64: 8, 32>}, {pipeline_mode = #tpu.pipeline_mode<synchronous>, transform_indices = @transform_1, window_bounds = array<i64: 32, 32>}, {pipeline_mode = #tpu.pipeline_mode<synchronous>, transform_indices = @transform_2, window_bounds = array<i64: 1, 32>}, {pipeline_mode = #tpu.pipeline_mode<synchronous>, transform_indices = @transform_3, window_bounds = array<i64: 32, 32>}, {pipeline_mode = #tpu.pipeline_mode<synchronous>, transform_indices = @transform_4, window_bounds = array<i64: 32, 64>}, {pipeline_mode = #tpu.pipeline_mode<synchronous>, transform_indices = @transform_5, window_bounds = array<i64: 1, 64>}, {pipeline_mode = #tpu.pipeline_mode<synchronous>, transform_indices = @transform_6, window_bounds = array<i64: 64, 64>}, {pipeline_mode = #tpu.pipeline_mode<synchronous>, transform_indices = @transform_7, window_bounds = array<i64: 64, 128>}, {pipeline_mode = #tpu.pipeline_mode<synchronous>, transform_indices = @transform_8, window_bounds = array<i64: 1, 128>}, {transform_indices = @transform_9, window_bounds = array<i64: 8, 128>}]} {
    %c0 = arith.constant 0 : index
    %c0_0 = arith.constant 0 : index
    %0 = vector.load %arg1[%c0, %c0_0] : memref<8x32xf32, #tpu.memory_space<vmem>>, vector<8x32xf32>
    %c0_1 = arith.constant 0 : index
    %c0_2 = arith.constant 0 : index
    %1 = vector.load %arg2[%c0_1, %c0_2] : memref<32x32xf32, #tpu.memory_space<vmem>>, vector<32x32xf32>
    %cst = arith.constant dense<0.000000e+00> : vector<8x32xf32>
    %2 = tpu.matmul %0, %1, %cst {dimension_numbers = #tpu.dot_dimension_numbers<[1], [0], [0], [1], [0, 0, 1, 1], [], []>} : vector<8x32xf32>, vector<32x32xf32>, vector<8x32xf32> -> vector<8x32xf32>
    %c0_3 = arith.constant 0 : index
    %c0_4 = arith.constant 0 : index
    %3 = vector.load %arg3[%c0_3, %c0_4] : memref<1x32xf32, #tpu.memory_space<vmem>>, vector<1x32xf32>
    %4 = vector.broadcast %3 : vector<1x32xf32> to vector<8x32xf32>
    %5 = arith.addf %2, %4 : vector<8x32xf32>
    %cst_5 = arith.constant 0.000000e+00 : f32
    %6 = vector.broadcast %cst_5 : f32 to vector<8x32xf32>
    %7 = arith.maximumf %5, %6 : vector<8x32xf32>
    %c0_6 = arith.constant 0 : index
    %c0_7 = arith.constant 0 : index
    %8 = vector.load %arg4[%c0_6, %c0_7] : memref<32x32xf32, #tpu.memory_space<vmem>>, vector<32x32xf32>
    %cst_8 = arith.constant dense<0.000000e+00> : vector<8x32xf32>
    %9 = tpu.matmul %7, %8, %cst_8 {dimension_numbers = #tpu.dot_dimension_numbers<[1], [0], [0], [1], [0, 0, 1, 1], [], []>} : vector<8x32xf32>, vector<32x32xf32>, vector<8x32xf32> -> vector<8x32xf32>
    %10 = arith.subf %7, %9 : vector<8x32xf32>
    %11 = arith.mulf %10, %10 : vector<8x32xf32>
    %c0_9 = arith.constant 0 : index
    %c0_10 = arith.constant 0 : index
    %12 = vector.load %arg4[%c0_9, %c0_10] : memref<32x32xf32, #tpu.memory_space<vmem>>, vector<32x32xf32>
    %cst_11 = arith.constant dense<0.000000e+00> : vector<8x32xf32>
    %13 = tpu.matmul %11, %12, %cst_11 {dimension_numbers = #tpu.dot_dimension_numbers<[1], [0], [0], [1], [0, 0, 1, 1], [], []>} : vector<8x32xf32>, vector<32x32xf32>, vector<8x32xf32> -> vector<8x32xf32>
    %cst_12 = arith.constant 9.99999974E-6 : f32
    %14 = vector.broadcast %cst_12 : f32 to vector<8x32xf32>
    %15 = arith.addf %13, %14 : vector<8x32xf32>
    %16 = math.rsqrt %15 : vector<8x32xf32>
    %17 = arith.mulf %10, %16 : vector<8x32xf32>
    %c0_13 = arith.constant 0 : index
    %c0_14 = arith.constant 0 : index
    %18 = vector.load %arg5[%c0_13, %c0_14] : memref<32x64xf32, #tpu.memory_space<vmem>>, vector<32x64xf32>
    %cst_15 = arith.constant dense<0.000000e+00> : vector<8x64xf32>
    %19 = tpu.matmul %17, %18, %cst_15 {dimension_numbers = #tpu.dot_dimension_numbers<[1], [0], [0], [1], [0, 0, 1, 1], [], []>} : vector<8x32xf32>, vector<32x64xf32>, vector<8x64xf32> -> vector<8x64xf32>
    %c0_16 = arith.constant 0 : index
    %c0_17 = arith.constant 0 : index
    %20 = vector.load %arg6[%c0_16, %c0_17] : memref<1x64xf32, #tpu.memory_space<vmem>>, vector<1x64xf32>
    %21 = vector.broadcast %20 : vector<1x64xf32> to vector<8x64xf32>
    %22 = arith.addf %19, %21 : vector<8x64xf32>
    %cst_18 = arith.constant 0.000000e+00 : f32
    %23 = vector.broadcast %cst_18 : f32 to vector<8x64xf32>
    %24 = arith.maximumf %22, %23 : vector<8x64xf32>
    %c0_19 = arith.constant 0 : index
    %c0_20 = arith.constant 0 : index
    %25 = vector.load %arg7[%c0_19, %c0_20] : memref<64x64xf32, #tpu.memory_space<vmem>>, vector<64x64xf32>
    %cst_21 = arith.constant dense<0.000000e+00> : vector<8x64xf32>
    %26 = tpu.matmul %24, %25, %cst_21 {dimension_numbers = #tpu.dot_dimension_numbers<[1], [0], [0], [1], [0, 0, 1, 1], [], []>} : vector<8x64xf32>, vector<64x64xf32>, vector<8x64xf32> -> vector<8x64xf32>
    %27 = arith.subf %24, %26 : vector<8x64xf32>
    %28 = arith.mulf %27, %27 : vector<8x64xf32>
    %c0_22 = arith.constant 0 : index
    %c0_23 = arith.constant 0 : index
    %29 = vector.load %arg7[%c0_22, %c0_23] : memref<64x64xf32, #tpu.memory_space<vmem>>, vector<64x64xf32>
    %cst_24 = arith.constant dense<0.000000e+00> : vector<8x64xf32>
    %30 = tpu.matmul %28, %29, %cst_24 {dimension_numbers = #tpu.dot_dimension_numbers<[1], [0], [0], [1], [0, 0, 1, 1], [], []>} : vector<8x64xf32>, vector<64x64xf32>, vector<8x64xf32> -> vector<8x64xf32>
    %cst_25 = arith.constant 9.99999974E-6 : f32
    %31 = vector.broadcast %cst_25 : f32 to vector<8x64xf32>
    %32 = arith.addf %30, %31 : vector<8x64xf32>
    %33 = math.rsqrt %32 : vector<8x64xf32>
    %34 = arith.mulf %27, %33 : vector<8x64xf32>
    %c0_26 = arith.constant 0 : index
    %c0_27 = arith.constant 0 : index
    %35 = vector.load %arg8[%c0_26, %c0_27] : memref<64x128xf32, #tpu.memory_space<vmem>>, vector<64x128xf32>
    %cst_28 = arith.constant dense<0.000000e+00> : vector<8x128xf32>
    %36 = tpu.matmul %34, %35, %cst_28 {dimension_numbers = #tpu.dot_dimension_numbers<[1], [0], [0], [1], [0, 0, 1, 1], [], []>} : vector<8x64xf32>, vector<64x128xf32>, vector<8x128xf32> -> vector<8x128xf32>
    %c0_29 = arith.constant 0 : index
    %c0_30 = arith.constant 0 : index
    %37 = vector.load %arg9[%c0_29, %c0_30] : memref<1x128xf32, #tpu.memory_space<vmem>>, vector<1x128xf32>
    %38 = vector.broadcast %37 : vector<1x128xf32> to vector<8x128xf32>
    %39 = arith.addf %36, %38 : vector<8x128xf32>
    %c0_31 = arith.constant 0 : index
    %c0_32 = arith.constant 0 : index
    %40 = vector.load %arg10[%c0_31, %c0_32] : memref<8x128xf32, #tpu.memory_space<vmem>>, vector<8x128xf32>
    tpu.vector_store %arg10[%c0_31, %c0_32], %39 {strides = array<i32>} : memref<8x128xf32, #tpu.memory_space<vmem>>, vector<8x128xf32>,
    return
  }
  func.func @transform_0(%arg0: i32) -> (i32, i32) {
    %c0_i32 = arith.constant 0 : i32
    %c0_i32_0 = arith.constant 0 : i32
    return %arg0, %c0_i32 : i32, i32
  }
  func.func @transform_1(%arg0: i32) -> (i32, i32) {
    %c0_i32 = arith.constant 0 : i32
    %c0_i32_0 = arith.constant 0 : i32
    %c0_i32_1 = arith.constant 0 : i32
    return %c0_i32, %c0_i32_0 : i32, i32
  }
  func.func @transform_2(%arg0: i32) -> (i32, i32) {
    %c0_i32 = arith.constant 0 : i32
    %c0_i32_0 = arith.constant 0 : i32
    %c0_i32_1 = arith.constant 0 : i32
    return %c0_i32, %c0_i32_0 : i32, i32
  }
  func.func @transform_3(%arg0: i32) -> (i32, i32) {
    %c0_i32 = arith.constant 0 : i32
    %c0_i32_0 = arith.constant 0 : i32
    %c0_i32_1 = arith.constant 0 : i32
    return %c0_i32, %c0_i32_0 : i32, i32
  }
  func.func @transform_4(%arg0: i32) -> (i32, i32) {
    %c0_i32 = arith.constant 0 : i32
    %c0_i32_0 = arith.constant 0 : i32
    %c0_i32_1 = arith.constant 0 : i32
    return %c0_i32, %c0_i32_0 : i32, i32
  }
  func.func @transform_5(%arg0: i32) -> (i32, i32) {
    %c0_i32 = arith.constant 0 : i32
    %c0_i32_0 = arith.constant 0 : i32
    %c0_i32_1 = arith.constant 0 : i32
    return %c0_i32, %c0_i32_0 : i32, i32
  }
  func.func @transform_6(%arg0: i32) -> (i32, i32) {
    %c0_i32 = arith.constant 0 : i32
    %c0_i32_0 = arith.constant 0 : i32
    %c0_i32_1 = arith.constant 0 : i32
    return %c0_i32, %c0_i32_0 : i32, i32
  }
  func.func @transform_7(%arg0: i32) -> (i32, i32) {
    %c0_i32 = arith.constant 0 : i32
    %c0_i32_0 = arith.constant 0 : i32
    %c0_i32_1 = arith.constant 0 : i32
    return %c0_i32, %c0_i32_0 : i32, i32
  }
  func.func @transform_8(%arg0: i32) -> (i32, i32) {
    %c0_i32 = arith.constant 0 : i32
    %c0_i32_0 = arith.constant 0 : i32
    %c0_i32_1 = arith.constant 0 : i32
    return %c0_i32, %c0_i32_0 : i32, i32
  }
  func.func @transform_9(%arg0: i32) -> (i32, i32) {
    %c0_i32 = arith.constant 0 : i32
    %c0_i32_0 = arith.constant 0 : i32
    return %arg0, %c0_i32 : i32, i32
  }
}

</mosaic_0001>

<bundles_post_ra>
// kernel: note_events_head_forward.1
= control target key start
LH: loop header
LB: loop body
LE: loop exit
PB: predicated region body
PF: predicated region fallthrough
CT: control target
= control target key end

     0   :  { %s2043_s0 = inlined_call_operand.hbm [shape: f32[16,32], index: 0, kind: input, shape index: {}]   ;;  %s2044_s1 = inlined_call_operand.hbm [shape: f32[32,32], index: 1, kind: input, shape index: {}]   ;;  %s2045_s2 = inlined_call_operand.vmem [shape: f32[1,32], index: 2, kind: input, shape index: {}]   ;;  %s2046_s3 = inlined_call_operand.hbm [shape: f32[32,32], index: 3, kind: input, shape index: {}]   ;;  %s2047_s4 = inlined_call_operand.hbm [shape: f32[32,64], index: 4, kind: input, shape index: {}]   ;;  %s2048_s5 = inlined_call_operand.vmem [shape: f32[1,64], index: 5, kind: input, shape index: {}]   ;;  %s2049_s6 = inlined_call_operand.hbm [shape: f32[64,64], index: 6, kind: input, shape index: {}]   ;;  %s2050_s7 = inlined_call_operand.hbm [shape: f32[64,128], index: 7, kind: input, shape index: {}]   ;;  %s2051_s8 = inlined_call_operand.vmem [shape: f32[1,128], index: 8, kind: input, shape index: {}]   ;;  %s2052_s9 = inlined_call_operand.vmem [shape: f32[16,128], index: 9, kind: output, shape index: {}]  }
   0x1   :  { %2055 = sst [smem:[#allocation16_spill]] %s2044_s1 }
   0x2   :  { %2056 = sst [smem:[#allocation17_spill]] %s2052_s9 }
   0x3   :  { %14 = vsyncpa [#allocation3], 0 }
   0x4   :  { %16 = vsyncpa [#allocation3 + $0x1], 0 }
   0x5   :  { %17 = vsyncpa [#allocation5], 0 }
   0x6   :  { %18 = vsyncpa [#allocation8], 0 }
   0x7   :  { %19 = vsyncpa [#allocation11], 0  ;;  %s1724_s30 = smov 0   ;;  %s1726_s10 = smov 0  }
   0x8   :  { %s1728_s11 = smov 0   ;;  %s1730_s12 = smov 0  }
   0x9 LB: > { %s1663_s13 = smov [#allocation4]   ;;  %s1745_s15 = sadd.s32 4294967295, %s1661_s12   ;;  %s1661_s12 = sphi %s1730_s12, %s2075_s12   ;;  %s1657_s11 = sphi %s1728_s11, %s2074_s11   ;;  %s1653_s10 = sphi %s1726_s10, %s2073_s10   ;;  %s1649_s30 = sphi %s1724_s30, %s2072_s30  }
   0xa   : > { %s262_s14 = sshll.u32 %s1663_s13, 4  ;;  %p1109_p0 = scmp.ge.s32.totalorder %s1661_s12, 1  ;;  %s1750_s14 = int_to_ptr.vmem [resolvable:$true] %s262_s14 }
   0xb   : > { %p2053_p1 = scmp.eq.s32.totalorder %s1745_s15, 0  ;;  %p250_p2 = scmp.lt.s32.totalorder %s1661_s12, 3 }
   0xc   : > { %s1664_s17 = smov [#allocation7]   ;;  %s1665_s20 = smov [#allocation6]  }
   0xd   : > { %p1752_p3 = pnand %p1109_p0, %p250_p2  ;;  %s291_s18 = sshll.u32 %s1664_s17, 4  ;;  %s1764_s18 = int_to_ptr.vmem [resolvable:$true] %s291_s18 }
   0xe   : > { %s278_s21 = sshll.u32 %s1665_s20, 4  ;;  %s2059_s1 = sld [smem:[#allocation16_spill]]  ;;  %s1766_s21 = int_to_ptr.vmem [resolvable:$true] %s278_s21 }
   0xf   : > { %s2057_s16 = scalar_select %p1752_p3, 1, 0 }
  0x10   : > { %p1368_p4 = pneg %p1752_p3 }
  0x12   : > { %p1760_p5 = pnand %p1368_p4, %p2053_p1 }
  0x14   : > { %s1445_s24 = scalar_lea.hbm %s2059_s1, 512  ;;  %p1776_p7 = pneg %p1760_p5 }
  0x15   : > { %p1446_p6 = scmp.ne.s32.totalorder %s2059_s1, %s1445_s24  ;;  %p1452_p10 = scmp.lt.u32.totalorder %s1445_s24, %s2059_s1 }
  0x17   : > { %p1448_p8 = pnand %p1776_p7, %p1446_p6 }
  0x19   : > { %p1449_p9 = pneg %p1448_p8 }
  0x1b   : > { %p1454_p11 = pnand %p1452_p10, %p1449_p9 }
  0x1d   : > { %1457 = shalt.err (!%p1454_p11)
}
  0x1e   : > { %s1458_s13 = scalar_lea.vmem %s1750_s14, 512  ;;  %p1466_p2 = scmp.lt.s32.totalorder %s1750_s14, %s1750_s14 }
  0x1f   : > { %p1459_p12 = scmp.ne.s32.totalorder %s1750_s14, %s1458_s13  ;;  %p1467_p4 = scmp.lt.s32.totalorder %s1458_s13, %s1458_s13 }
  0x21   : > { %p1461_p13 = pnand %p1459_p12, %p1776_p7  ;;  %p1468_p6 = por %p1467_p4, %p1466_p2 }
  0x23   : > { %p1462_p0 = pneg %p1461_p13 }
  0x25   : > { %p1469_p8 = pnand %p1468_p6, %p1462_p0 }
  0x27   : > { %1472 = shalt.err (!%p1469_p8)
}
  0x28   : > { %s1666_s17 = smov 128   ;;  %s1667_s20 = smov 8  }
  0x29   : > { %1371 = dma.hbm_to_vmem [thread:$0]  (!%p1760_p5), %s2059_s1, 512, %s1750_s14, [#allocation5], %s1666_s17, %s1666_s17, %s1667_s20  }
  0x2a   : > { %s1473_s26 = scalar_lea.hbm %s2047_s4, 512 }
  0x2b   : > { %p1474_p9 = scmp.ne.s32.totalorder %s2047_s4, %s1473_s26  ;;  %p1480_p12 = scmp.lt.u32.totalorder %s1473_s26, %s2047_s4 }
  0x2d   : > { %p1476_p10 = pnand %p1474_p9, %p1776_p7 }
  0x2f   : > { %p1477_p11 = pneg %p1476_p10 }
  0x31   : > { %p1482_p13 = pnand %p1480_p12, %p1477_p11 }
  0x33   : > { %1485 = shalt.err (!%p1482_p13)
}
  0x34   : > { %s1486_s14 = scalar_lea.vmem %s1764_s18, 512  ;;  %p1494_p6 = scmp.lt.s32.totalorder %s1764_s18, %s1764_s18 }
  0x35   : > { %p1487_p0 = scmp.ne.s32.totalorder %s1764_s18, %s1486_s14  ;;  %p1495_p8 = scmp.lt.s32.totalorder %s1486_s14, %s1486_s14 }
  0x37   : > { %p1489_p2 = pnand %p1487_p0, %p1776_p7  ;;  %p1496_p9 = por %p1495_p8, %p1494_p6 }
  0x39   : > { %p1490_p4 = pneg %p1489_p2 }
  0x3b   : > { %p1497_p10 = pnand %p1496_p9, %p1490_p4 }
  0x3d   : > { %1500 = shalt.err (!%p1497_p10)
}
  0x3e   : > { %1377 = dma.hbm_to_vmem [thread:$0]  (!%p1760_p5), %s2047_s4, 512, %s1764_s18, [#allocation8], %s1666_s17, %s1666_s17, %s1667_s20  }
  0x3f   : > { %s1501_s25 = scalar_lea.hbm %s2046_s3, 512 }
  0x40   : > { %p1502_p11 = scmp.ne.s32.totalorder %s2046_s3, %s1501_s25  ;;  %p1508_p0 = scmp.lt.u32.totalorder %s1501_s25, %s2046_s3 }
  0x42   : > { %p1504_p12 = pnand %p1502_p11, %p1776_p7 }
  0x44   : > { %p1505_p13 = pneg %p1504_p12 }
  0x46   : > { %p1510_p2 = pnand %p1508_p0, %p1505_p13 }
  0x48   : > { %1513 = shalt.err (!%p1510_p2)
}
  0x49   : > { %s1514_s18 = scalar_lea.vmem %s1766_s21, 512  ;;  %p1522_p9 = scmp.lt.s32.totalorder %s1766_s21, %s1766_s21 }
  0x4a   : > { %p1515_p4 = scmp.ne.s32.totalorder %s1766_s21, %s1514_s18  ;;  %p1523_p10 = scmp.lt.s32.totalorder %s1514_s18, %s1514_s18 }
  0x4c   : > { %p1517_p6 = pnand %p1515_p4, %p1776_p7  ;;  %p1524_p11 = por %p1523_p10, %p1522_p9 }
  0x4e   : > { %p1518_p8 = pneg %p1517_p6 }
  0x50   : > { %p1525_p12 = pnand %p1524_p11, %p1518_p8 }
  0x52   : > { %1528 = shalt.err (!%p1525_p12)
}
  0x53   : > { %1374 = dma.hbm_to_vmem [thread:$0]  (!%p1760_p5), %s2046_s3, 512, %s1766_s21, [#allocation5], %s1666_s17, %s1666_s17, %s1667_s20  }
  0x54   : > { %s1668_s22 = smov [#allocation9]   ;;  %s1669_s24 = smov [#allocation10]  }
  0x55   : > { %s307_s23 = sshll.u32 %s1668_s22, 4  ;;  %s320_s25 = sshll.u32 %s1669_s24, 4  ;;  %s308_s23 = int_to_ptr.vmem [resolvable:$true] %s307_s23  ;;  %s321_s25 = int_to_ptr.vmem [resolvable:$true] %s320_s25 }
  0x56   : > { %s1529_s29 = scalar_lea.hbm %s2049_s6, 1024 }
  0x57   : > { %p1530_p13 = scmp.ne.s32.totalorder %s2049_s6, %s1529_s29  ;;  %p1536_p4 = scmp.lt.u32.totalorder %s1529_s29, %s2049_s6 }
  0x59   : > { %p1532_p0 = pnand %p1530_p13, %p1776_p7 }
  0x5b   : > { %p1533_p2 = pneg %p1532_p0 }
  0x5d   : > { %p1538_p6 = pnand %p1536_p4, %p1533_p2 }
  0x5f   : > { %1541 = shalt.err (!%p1538_p6)
}
  0x60   : > { %s1542_s21 = scalar_lea.vmem %s308_s23, 1024  ;;  %p1550_p11 = scmp.lt.s32.totalorder %s308_s23, %s308_s23 }
  0x61   : > { %p1543_p8 = scmp.ne.s32.totalorder %s308_s23, %s1542_s21  ;;  %p1551_p12 = scmp.lt.s32.totalorder %s1542_s21, %s1542_s21 }
  0x63   : > { %p1545_p9 = pnand %p1543_p8, %p1776_p7  ;;  %p1552_p1 = por %p1551_p12, %p1550_p11 }
  0x65   : > { %p1546_p10 = pneg %p1545_p9 }
  0x67   : > { %p1553_p3 = pnand %p1552_p1, %p1546_p10 }
  0x69   : > { %1556 = shalt.err (!%p1553_p3)
}
  0x6a   : > { %1380 = dma.hbm_to_vmem [thread:$0]  (!%p1760_p5), %s2049_s6, 1024, %s308_s23, [#allocation8], %s1666_s17, %s1666_s17, %s1667_s20  }
  0x6b   : > { %s1557_s26 = scalar_lea.hbm %s2050_s7, 1024 }
  0x6c   : > { %p1558_p1 = scmp.ne.s32.totalorder %s2050_s7, %s1557_s26  ;;  %p1564_p0 = scmp.lt.u32.totalorder %s1557_s26, %s2050_s7 }
  0x6e   : > { %p1560_p3 = pnand %p1558_p1, %p1776_p7 }
  0x70   : > { %p1561_p13 = pneg %p1560_p3 }
  0x72   : > { %p1566_p2 = pnand %p1564_p0, %p1561_p13 }
  0x74   : > { %1569 = shalt.err (!%p1566_p2)
}
  0x75   : > { %s1570_s14 = scalar_lea.vmem %s321_s25, 1024  ;;  %p1578_p9 = scmp.lt.s32.totalorder %s321_s25, %s321_s25 }
  0x76   : > { %p1571_p4 = scmp.ne.s32.totalorder %s321_s25, %s1570_s14  ;;  %p1579_p10 = scmp.lt.s32.totalorder %s1570_s14, %s1570_s14 }
  0x78   : > { %p1573_p6 = pnand %p1571_p4, %p1776_p7  ;;  %p1580_p11 = por %p1579_p10, %p1578_p9 }
  0x7a   : > { %p1574_p8 = pneg %p1573_p6 }
  0x7c   : > { %p1581_p12 = pnand %p1580_p11, %p1574_p8 }
  0x7e   : > { %1584 = shalt.err (!%p1581_p12)
}
  0x7f   : > { %1383 = dma.hbm_to_vmem [thread:$0]  (!%p1760_p5), %s2050_s7, 1024, %s321_s25, [#allocation11], %s1666_s17, %s1666_s17, %s1667_s20  }
  0x80   : > { %s1895_s19 = sadd.s32 1, %s1661_s12   ;;  %s32_s1 = sadd.s32 1, %s1657_s11 }
  0x81   : > { %s29_s27 = ssub.s32 %s1661_s12, %s1895_s19  ;;  %p39_p1 = scmp.ne.s32.totalorder %s1657_s11, %s1653_s10 }
  0x82   : > { %p30_p7 = scmp.eq.s32.totalorder %s29_s27, 0  ;;  %p40_p3 = scmp.eq.s32.totalorder %s1661_s12, 0 }
  0x83   : > { %p45_p13 = scmp.ne.s32.totalorder %s1653_s10, %s1649_s30  ;;  %p2061_p2 = scmp.eq.s32.totalorder %s1745_s15, 0 }
  0x84   : > { %s1906_s9 = scalar_select %p30_p7, %s1657_s11, %s32_s1  }
  0x85   : > { %p41_p0 = por %p40_p3, %p39_p1  ;;  %p1910_p4 = por %p2061_p2, %p45_p13 }
  0x86   : > { %p1393_p6 = scmp.lt.s32.totalorder %s1661_s12, 2  ;;  %s337_s24 = sand.u32 1, %s1657_s11  }
  0x87   : > { %s1116_s17 = sshll.u32 %s337_s24, 3  ;;  %s1117_s20 = sshll.u32 %s1661_s12, 7 }
  0x88   : > { %s1920_s28 = scalar_lea.hbm %s2043_s0, %s1117_s20  ;;  %s341_s30 = scalar_lea.vmem [#allocation2], %s1116_s17 }
  0x89   : > { %s348_s29 = sshll.u32 %s341_s30, 4  ;;  %p1924_p5 = pnand %p1393_p6, %p41_p0  ;;  %s1922_s29 = int_to_ptr.vmem [resolvable:$true] %s348_s29 }
  0x8a   : > { %s338_s12 = scalar_lea.sflag [#allocation3], %s337_s24  ;;  %s1585_s18 = scalar_lea.hbm %s1920_s28, 128 }
  0x8b   : > { %p1586_p8 = scmp.ne.s32.totalorder %s1920_s28, %s1585_s18  ;;  %p1587_p9 = pneg %p1924_p5 }
  0x8c   : > { %s1590_s21 = scalar_lea.hbm %s2043_s0, 256  ;;  %p1591_p12 = scmp.lt.u32.totalorder %s1920_s28, %s2043_s0 }
  0x8d   : > { %p1588_p10 = pnand %p1587_p9, %p1586_p8  ;;  %p1592_p7 = scmp.lt.u32.totalorder %s1590_s21, %s1585_s18 }
  0x8e   : > { %p1594_p3 = scmp.lt.u32.totalorder %s1585_s18, %s1920_s28 }
  0x8f   : > { %p1589_p11 = pneg %p1588_p10  ;;  %p1593_p1 = por %p1592_p7, %p1591_p12 }
  0x91   : > { %p1595_p13 = por %p1594_p3, %p1593_p1 }
  0x93   : > { %p1596_p0 = pnand %p1595_p13, %p1589_p11 }
  0x95   : > { %1599 = shalt.err (!%p1596_p0)
}
  0x96   : > { %s1600_s24 = scalar_lea.vmem %s1922_s29, 128  ;;  %s1670_s17 = smov [#allocation2]  }
  0x97   : > { %p1601_p2 = scmp.ne.s32.totalorder %s1922_s29, %s1600_s24  ;;  %s1605_s20 = sshll.u32 %s1670_s17, 4  ;;  %s1606_s20 = int_to_ptr.vmem [resolvable:$false] %s1605_s20 }
  0x98   : > { %s1607_s25 = scalar_lea.vmem %s1606_s20, 256  ;;  %p1608_p10 = scmp.lt.s32.totalorder %s1922_s29, %s1606_s20 }
  0x99   : > { %p1603_p6 = pnand %p1601_p2, %p1587_p9  ;;  %p1609_p12 = scmp.lt.s32.totalorder %s1607_s25, %s1600_s24 }
  0x9b   : > { %p1604_p8 = pneg %p1603_p6  ;;  %p1610_p7 = por %p1609_p12, %p1608_p10 }
  0x9d   : > { %p1611_p1 = pnand %p1610_p7, %p1604_p8 }
  0x9f   : > { %1614 = shalt.err (!%p1611_p1)
}
  0xa0   : > { %1387 = dma.hbm_to_vmem [thread:$0]  (!%p1924_p5), %s1920_s28, 128, %s1922_s29, %s338_s12  }
  0xa1   : > { %p2064_p11 = scmp.ne.s32.totalorder %s2057_s16, 0 }
  0xa2   : > { %s359_s26 = sand.u32 (!%p2064_p11), 1, %s1653_s10  }
  0xa3   : > { %357 = sbr.rel (%p2064_p11) target bundleno = 1724 (0x6bc), region = 56  ;;  %s1956_s30 = sshll.u32 (!%p2064_p11), %s359_s26, 3 }
  0xa4   : > { %s360_s18 = scalar_lea.sflag (!%p2064_p11), [#allocation3], %s359_s26  ;;  %s363_s14 = scalar_lea.vmem (!%p2064_p11), [#allocation2], %s1956_s30 }
  0xaa   : > { %1632 = dma.done.wait (%p1910_p4), %s360_s18, 128  }
  0xab   : > { %1634 = vsyncadd (%p1910_p4), %s360_s18, 4294967168  ;;  %p2065_p9 = scmp.eq.s32.totalorder %s1745_s15, 0 }
  0xad   : > { %1636 = dma.done.wait (%p2065_p9), [#allocation5], 1024   ;;  %p2066_p5 = pmov %p2065_p9 }
  0xaf   : > { %1638 = vsyncadd (%p2066_p5), [#allocation5], 4294966272  ;;  %p2067_p3 = pmov %p2066_p5 }
  0xb1   : > { %1640 = dma.done.wait (%p2067_p3), [#allocation8], 1536   ;;  %p2068_p13 = pmov %p2067_p3 }
  0xb2   : > { %p2069_p0 = pmov %p2067_p3 }
  0xb3   : > { %1642 = vsyncadd (%p2068_p13), [#allocation8], 4294965760 }
  0xb4   : > { %1644 = dma.done.wait (%p2069_p0), [#allocation11], 1024   ;;  %p2070_p2 = pmov %p2069_p0 }
  0xb5   : > { %v1671_v0 = vmov 0.0|0.0   ;;  %vm1672_vm0 = vmmov 0   ;;  %v1673_v1 = vmov 0.0   ;;  %v422_v2 = vld [vmem:[#allocation4] sm:$0xff]  ;;  %v423_v3 = vld [vmem:[#allocation4 + $0x8] sm:$0xff]  ;;  %v424_v4 = vld [vmem:[#allocation4 + $0x10] sm:$0xff] }
  0xb6   : > { %1646 = vsyncadd (%p2070_p2), [#allocation11], 4294966272  ;;  %1286 = vmatprep.subr.bf16.mxu1 %v1671_v0  ;;  %1193 = vmatprep.mubr.msk.f32.mxu1 %vm1672_vm0, %v1673_v1  ;;  %v1287_v5 = vpack.c.bf16 %v423_v3, %v422_v2  ;;  %v425_v6 = vld [vmem:[#allocation4 + $0x18] sm:$0xff]  ;;  %v508_v7 = vld [vmem:[#allocation6] sm:$0xff]  ;;  %vm433_vm1 = vcmask 261120   ;;  %vm755_vm2 = vcmask 523264  }
  0xb7   : > { %1298 = vmatprep.subr.bf16.mxu0 %v1671_v0  ;;  %1215 = vmatprep.mubr.msk.f32.mxu0 %vm1672_vm0, %v1673_v1  ;;  %v509_v8 = vld [vmem:[#allocation6 + $0x8] sm:$0xff]  ;;  %v1290_v9 = vpack.c.bf16 %v425_v6, %v424_v4  ;;  %v421_v11 = vld [vmem:[%s363_s14] sm:$0xff]  ;;  %v662_v24 = vld [vmem:[#allocation7] sm:$0xff]  ;;  %p417_p4 = scmp.lt.s32.totalorder %s1745_s15, 1  ;;  %s2071_s1 = sld [smem:[#allocation17_spill]] }
  0xb8   : > { %1288 = vmatpush3.bf16.msra.mxu1 %v1287_v5  ;;  %v1293_v10 = vpack.c.bf16 %v509_v8, %v508_v7  ;;  %v510_v12 = vld [vmem:[#allocation6 + $0x10] sm:$0xff]  ;;  %v511_v13 = vld [vmem:[#allocation6 + $0x18] sm:$0xff]  ;;  %v663_v25 = vld [vmem:[#allocation7 + $0x8] sm:$0xff] }
  0xb9   : > { %1289 = vmatprep.subr.bf16.mxu1 %v1671_v0  ;;  %v1296_v14 = vpack.c.bf16 %v511_v13, %v510_v12  ;;  %v1126_v15 = vld [vmem:[%s2045_s2] ss:$0 sm:$0xff]  ;;  %v1305_v27 = vpack.c.bf16 %v663_v25, %v662_v24  ;;  %v665_v28 = vld [vmem:[#allocation7 + $0x18] sm:$0xff]  ;;  %v747_v30 = vld [vmem:[#allocation9] sm:$0xff]  ;;  %s2077_s15 = smov (!%p417_p4, %s1745_s15), 1 }
  0xba   : > { %1300 = vmatpush3.bf16.msra.mxu0 %v1293_v10  ;;  %v664_v26 = vld [vmem:[#allocation7 + $0x10] sm:$0xff]  ;;  %v748_v31 = vld [vmem:[#allocation9 + $0x8] sm:$0xff]  ;;  %v750_v34 = vld [vmem:[#allocation9 + $0x18] sm:$0xff]  ;;  %s1125_s13 = sshll.u32 %s2077_s15, 3 }
  0xbb   : > { %1301 = vmatprep.subr.bf16.mxu0 %v1671_v0  ;;  %v1308_v29 = vpack.c.bf16 %v665_v28, %v664_v26  ;;  %v749_v32 = vld [vmem:[#allocation9 + $0x10] sm:$0xff]  ;;  %v1311_v33 = vpack.c.bf16 %v748_v31, %v747_v30  ;;  %v751_v36 = vld [vmem:[#allocation9 + $0x20] sm:$0xff]  ;;  %v752_v37 = vld [vmem:[#allocation9 + $0x28] sm:$0xff] }
  0xbc   : > { %1291 = vmatpush3.bf16.msra.mxu1 %v1290_v9  ;;  %v1314_v35 = vpack.c.bf16 %v750_v34, %v749_v32  ;;  %v1317_v38 = vpack.c.bf16 %v752_v37, %v751_v36  ;;  %v753_v44 = vld [vmem:[#allocation9 + $0x30] sm:$0xff]  ;;  %v754_v45 = vld [vmem:[#allocation9 + $0x38] sm:$0xff]  ;;  %v906_v56 = vld [vmem:[#allocation10] sm:$0xff] }
  0xbd   : > { %1292 = vmatprep.subr.bf16.mxu1 %v1671_v0  ;;  %v1320_v46 = vpack.c.bf16 %v754_v45, %v753_v44  ;;  %v1130_v47 = vld [vmem:[%s2048_s5] ss:$0 sm:$0xff]  ;;  %v907_v57 = vld [vmem:[#allocation10 + $0x8] sm:$0xff]  ;;  %v909_v60 = vld [vmem:[#allocation10 + $0x18] sm:$0xff]  ;;  %s420_s24 = scalar_lea.vmem %s2071_s1, %s1125_s13 }
  0xbe   : > { %1303 = vmatpush3.bf16.msra.mxu0 %v1296_v14  ;;  %v1335_v58 = vpack.c.bf16 %v907_v57, %v906_v56  ;;  %v908_v59 = vld [vmem:[#allocation10 + $0x10] sm:$0xff]  ;;  %v910_v62 = vld [vmem:[#allocation10 + $0x20] sm:$0xff]  ;;  %v911_v63 = vld [vmem:[#allocation10 + $0x28] sm:$0xff] }
  0xbf   : > { %1194 = vmatmul.mubr.msk.f32.vlgmr.msra.gmra.mrb[0].mxu1 %vm433_vm1, %v421_v11  ;;  %1310 = vmatprep.subr.bf16.mxu0 %v1671_v0  ;;  %v1338_v61 = vpack.c.bf16 %v909_v60, %v908_v59  ;;  %v912_v2 = vld [vmem:[#allocation10 + $0x30] sm:$0xff]  ;;  %v913_v3 = vld [vmem:[#allocation10 + $0x38] sm:$0xff] }
  0xc0   : > { %1294 = vmatpush3.bf16.msra.mxu1 %v1293_v10  ;;  %1204 = vmatprep.mubr.msk.f32.mxu1 %vm1672_vm0, %v1673_v1  ;;  %v1344_v4 = vpack.c.bf16 %v913_v3, %v912_v2  ;;  %v1134_v10 = vld [vmem:[%s2051_s8] ss:$0 sm:$0xff] }
  0xc1   : > { %1295 = vmatprep.subr.bf16.mxu1 %v1671_v0 }
  0xc4   : > { %1297 = vmatpush3.bf16.msra.mxu1 %v1296_v14 }
  0xc5   : > { %1304 = vmatprep.subr.bf16.mxu1 %v1671_v0 }
 0x192   : > { %v503_v16 = vpop.f32.mrb[0].mxu1 }
 0x193   : > { %v504_v17 = vadd.f32 %v1126_v15, %v503_v16  ;;  %v1195_v18 = vpop.f32.mrb[1].mxu1 }
 0x195   : > { %v507_v19 = vmax.f32 %v504_v17, 0.0 }
 0x197   : > { %1205 = vmatmul.mubr.msk.f32.vlgmr.msra.gmra.mrb[2].mxu1 %vm433_vm1, %v507_v19 }
 0x198   : > { %1226 = vmatprep.mubr.msk.f32.mxu1 %vm1672_vm0, %v1673_v1  ;;  %1306 = vmatpush3.bf16.msra.mxu1 %v1305_v27 }
 0x199   : > { %1307 = vmatprep.subr.bf16.mxu1 %v1671_v0 }
 0x19c   : > { %1309 = vmatpush3.bf16.msra.mxu1 %v1308_v29 }
 0x19d   : > { %1322 = vmatprep.subr.bf16.mxu1 %v1671_v0 }
 0x26a   : > { %v581_v20 = vpop.f32.mrb[2].mxu1 }
 0x26b   : > { %v585_v21 = vsub.f32 %v507_v19, %v581_v20  ;;  %v1206_v22 = vpop.f32.mrb[3].mxu1 }
 0x26d   : > { %v586_v23 = vmul.f32 %v585_v21, %v585_v21 }
 0x26f   : > { %1216 = vmatmul.mubr.msk.f32.vlgmr.msra.gmra.mrb[0].mxu0 %vm433_vm1, %v586_v23 }
 0x270   : > { %1245 = vmatprep.mubr.msk.f32.mxu0 %vm1672_vm0, %v1673_v1  ;;  %1312 = vmatpush3.bf16.msra.mxu0 %v1311_v33 }
 0x271   : > { %1313 = vmatprep.subr.bf16.mxu0 %v1671_v0 }
 0x274   : > { %1315 = vmatpush3.bf16.msra.mxu0 %v1314_v35 }
 0x275   : > { %1316 = vmatprep.subr.bf16.mxu0 %v1671_v0 }
 0x278   : > { %1318 = vmatpush3.bf16.msra.mxu0 %v1317_v38 }
 0x279   : > { %1319 = vmatprep.subr.bf16.mxu0 %v1671_v0 }
 0x27c   : > { %1321 = vmatpush3.bf16.msra.mxu0 %v1320_v46 }
 0x27d   : > { %1334 = vmatprep.subr.bf16.mxu0 %v1671_v0 }
 0x342   : > { %v656_v39 = vpop.f32.mrb[0].mxu0 }
 0x343   : > { %v657_v40 = vadd.f32 1e-05, %v656_v39  ;;  %v1217_v41 = vpop.f32.mrb[1].mxu0 }
 0x345   : > { %1441 = vrsqrt.f32 %v657_v40 }
 0x34f   : > { %v1442_v42 = vpop.eup %1441 }
 0x350   : > { %v661_v43 = vmul.f32 %v1442_v42, %v585_v21 }
 0x352   : > { %1227 = vmatmul.mubr.msk.f32.vlgmr.msra.gmra.mrb[4].mxu1 %vm433_vm1, %v661_v43 }
 0x353   : > { %1324 = vmatpush3.bf16.msra.mxu1 %v1311_v33  ;;  %1264 = vmatprep.mubr.msk.f32.mxu1 %vm1672_vm0, %v1673_v1 }
 0x354   : > { %1325 = vmatprep.subr.bf16.mxu1 %v1671_v0 }
 0x357   : > { %1327 = vmatpush3.bf16.msra.mxu1 %v1314_v35 }
 0x358   : > { %1328 = vmatprep.subr.bf16.mxu1 %v1671_v0 }
 0x35b   : > { %1330 = vmatpush3.bf16.msra.mxu1 %v1317_v38 }
 0x35c   : > { %1331 = vmatprep.subr.bf16.mxu1 %v1671_v0 }
 0x35f   : > { %1333 = vmatpush3.bf16.msra.mxu1 %v1320_v46 }
 0x425   : > { %v742_v48 = vpop.f32.mrb[4].mxu1 }
 0x426   : > { %v743_v49 = vadd.f32 %v1130_v47, %v742_v48  ;;  %v1228_v50 = vpop.f32.mrb[5].mxu1 }
 0x428   : > { %v746_v51 = vmax.f32 %v743_v49, 0.0 }
 0x42a   : > { %1246 = vmatmul.mubr.msk.f32.vlgmr.msra.gmra.mrb[2].mxu0 %vm755_vm2, %v746_v51 }
 0x42b   : > { %1283 = vmatprep.mubr.msk.f32.mxu0 %vm1672_vm0, %v1673_v1  ;;  %1336 = vmatpush3.bf16.msra.mxu0 %v1335_v58  ;;  %v1341_v1 = vpack.c.bf16 %v911_v63, %v910_v62 }
 0x42c   : > { %1337 = vmatprep.subr.bf16.mxu0 %v1671_v0 }
 0x42f   : > { %1339 = vmatpush3.bf16.msra.mxu0 %v1338_v61 }
 0x430   : > { %1340 = vmatprep.subr.bf16.mxu0 %v1671_v0 }
 0x433   : > { %1342 = vmatpush3.bf16.msra.mxu0 %v1341_v1 }
 0x434   : > { %1343 = vmatprep.subr.bf16.mxu0 %v1671_v0 }
 0x437   : > { %1345 = vmatpush3.bf16.msra.mxu0 %v1344_v4 }
 0x4fd   : > { %v825_v52 = vpop.f32.mrb[2].mxu0 }
 0x4fe   : > { %v829_v53 = vsub.f32 %v746_v51, %v825_v52  ;;  %v1247_v54 = vpop.f32.mrb[3].mxu0 }
 0x500   : > { %v830_v55 = vmul.f32 %v829_v53, %v829_v53 }
 0x502   : > { %1265 = vmatmul.mubr.msk.f32.vlgmr.msra.gmra.mrb[6].mxu1 %vm755_vm2, %v830_v55 }
 0x5d5   : > { %v900_v5 = vpop.f32.mrb[6].mxu1 }
 0x5d6   : > { %v901_v6 = vadd.f32 1e-05, %v900_v5  ;;  %v1266_v7 = vpop.f32.mrb[7].mxu1 }
 0x5d8   : > { %1443 = vrsqrt.f32 %v901_v6 }
 0x5e2   : > { %v1444_v8 = vpop.eup %1443 }
 0x5e3   : > { %v905_v9 = vmul.f32 %v1444_v8, %v829_v53 }
 0x5e5   : > { %1284 = vmatmul.mubr.msk.f32.vlgmr.msra.gmra.mrb[4].mxu0 %vm755_vm2, %v905_v9 }
 0x6b8   : > { %v990_v0 = vpop.f32.mrb[4].mxu0 }
 0x6b9   : > { %v991_v11 = vadd.f32 %v1134_v10, %v990_v0  ;;  %v1285_v12 = vpop.f32.mrb[5].mxu0 }
 0x6bb   : > { %994 = vst [vmem:[%s420_s24] sm:$0xff] %v991_v11 }
 0x6bc PF: > { %p22_p6 = scmp.ge.s32.totalorder %s1895_s19, 4   ;;  %s2072_s30 = smov %s1653_s10 }
 0x6bd   : > { %s2073_s10 = smov %s1657_s11  ;;  %s2074_s11 = smov %s1906_s9 }
 0x6be   : > { %s2075_s12 = smov %s1895_s19  ;;  %24 = sbr.rel (!%p22_p6) target bundleno = 9 (0x9), region = 116 }
 0x6c5   :  { %1014 = vsyncpa [#allocation3], 1 }
 0x6c6   :  { %1016 = vsyncpa [#allocation3 + $0x1], 1 }
 0x6c7   :  { %1017 = vsyncpa [#allocation5], 1 }
 0x6c8   :  { %1018 = vsyncpa [#allocation8], 1 }
 0x6c9   :  { %1019 = vsyncpa [#allocation11], 1 }

</bundles_post_ra>
